<compile_context>
chip_gen: v6e
topology: v6e:2x2x1
jax: 0.10.0
libtpu: 0.0.40
codegen_flags: <defaults>
</compile_context>

<pallas_src>
import jax
import jax.numpy as jnp
from jax.experimental import pallas as pl
from jax.experimental.pallas import tpu as pltpu

T_0 = 0.0
T_N = 5.0
N = 100        # number of time points, same as the reference script
HID = 32
LANE = 128     # TPU lane width; batch axis is padded to a multiple of this


def _mlp_kernel(t_ref, w1_ref, b1_ref, w2_ref, b2_ref, w3_ref, b3_ref, o_ref):
    # t_ref: (1, N_pad) time samples on lanes.
    t = t_ref[...]
    t_norm = (t - T_0) / (T_N - T_0) * 2.0 - 1.0                     # (1, N_pad)

    # Layer 1: Linear(1 -> 32) + Tanh.  Contraction dim K=1 -> outer product on
    # the VPU (broadcast multiply) instead of an MXU matmul with <1% utilization.
    h1 = jnp.tanh(w1_ref[...] * t_norm + b1_ref[...])                # (32, N_pad)

    # Layer 2: Linear(32 -> 32) + Tanh.  Single MXU matmul, lane-dense result.
    h2 = jnp.tanh(
        jnp.dot(w2_ref[...], h1, preferred_element_type=jnp.float32)
        + b2_ref[...])                                               # (32, N_pad)

    # Layer 3: Linear(32 -> 1).  Output width 1 -> multiply + cross-sublane
    # reduce (XLU) instead of an MXU matmul that keeps one lane of the result.
    out = jnp.sum(w3_ref[...] * h2, axis=0, keepdims=True) + b3_ref[0, 0]
    o_ref[...] = out.astype(o_ref.dtype)                             # (1, N_pad)


def mlp_forward(t, params):
    """t: (N, 1) f32 time samples. Returns (N, 1) f32, matching MLP.forward().

    The whole hot path (normalize -> Linear -> Tanh -> Linear -> Tanh -> Linear)
    runs in one gridless pallas_call; at this size the cost is dominated by the
    launch + DMA fixed overhead, so everything is fused into a single call.
    """
    n = t.shape[0]
    n_pad = max(LANE, pl.cdiv(n, LANE) * LANE)

    # Batch on lanes: one zero-padded (1, n_pad) row.  Padded lanes compute
    # harmless finite garbage that is sliced off below.
    t_row = jnp.zeros((1, n_pad), jnp.float32).at[0, :n].set(t[:, 0])

    w1, b1 = params["w1"], params["b1"]      # (32, 1), (32, 1)
    w2, b2 = params["w2"], params["b2"]      # (32, 32), (32, 1)
    w3, b3 = params["w3"], params["b3"]      # (32, 1), (1, 1)

    full = lambda shape: pl.BlockSpec(shape, lambda: tuple(0 for _ in shape))

    out_row = pl.pallas_call(
        _mlp_kernel,
        out_shape=jax.ShapeDtypeStruct((1, n_pad), jnp.float32),
        grid=(),
        in_specs=[
            full((1, n_pad)),                               # t (lanes = batch)
            full(w1.shape), full(b1.shape),                 # layer 1
            full(w2.shape), full(b2.shape),                 # layer 2
            full(w3.shape),                                 # layer 3 weight
            pl.BlockSpec(memory_space=pltpu.MemorySpace.SMEM),  # b3 scalar
        ],
        out_specs=full((1, n_pad)),                         # lane-dense output
    )(t_row, w1, b1, w2, b2, w3, b3)

    # TODO(synk): if this MLP is evaluated per ODE-solver step, batch several
    # RK stages / time grids into one call (and add a "parallel" grid over the
    # batch axis for large N) instead of launching per step.
    return out_row[0, :n].reshape(n, 1)


def init_params(key):
    """Deterministic init matching nn.Linear shapes: (1->32), (32->32), (32->1),
    stored in the kernel's feature-major layout (see module docstring)."""
    k1, k2, k3, k4, k5, k6 = jax.random.split(key, 6)

    def uniform(k, shape, fan_in):
        bound = 1.0 / jnp.sqrt(jnp.float32(fan_in))
        return jax.random.uniform(k, shape, jnp.float32, -bound, bound)

    return {
        "w1": uniform(k1, (HID, 1), 1),       # Linear(1, 32).weight
        "b1": uniform(k2, (HID, 1), 1),       # Linear(1, 32).bias  (column)
        "w2": uniform(k3, (HID, HID), HID),   # Linear(32, 32).weight
        "b2": uniform(k4, (HID, 1), HID),     # Linear(32, 32).bias (column)
        "w3": uniform(k5, (HID, 1), HID),     # Linear(32, 1).weight.T (column)
        "b3": uniform(k6, (1, 1), HID),       # Linear(32, 1).bias  (scalar)
    }


def mlp_reference(t, params):
    """Pure-JAX reference (batch-major matmuls) for the correctness check."""
    t_norm = (t - T_0) / (T_N - T_0) * 2.0 - 1.0
    h1 = jnp.tanh(t_norm @ params["w1"].T + params["b1"].T)
    h2 = jnp.tanh(h1 @ params["w2"].T + params["b2"].T)
    return h2 @ params["w3"] + params["b3"]


if __name__ == "__main__":
    key = jax.random.PRNGKey(0)
    params = init_params(key)

    # Same time points as the reference script: linspace(T_0, T_N, N), feature-last.
    time_points = jnp.linspace(T_0, T_N, N, dtype=jnp.float32).reshape(N, 1)

    out = jax.block_until_ready(mlp_forward(time_points, params))
    ref = mlp_reference(time_points, params)

    assert out.shape == (N, 1), out.shape
    assert jnp.allclose(out, ref, atol=1e-5, rtol=1e-5), "mismatch vs reference"

    print("KERNEL_OK")
</pallas_src>

<mosaic_0001>
module attributes {stable_mosaic.version = 11 : i64} {
  func.func @_mlp_kernel(%arg0: memref<1x128xf32, #tpu.memory_space<vmem>>, %arg1: memref<32x1xf32, #tpu.memory_space<vmem>>, %arg2: memref<32x1xf32, #tpu.memory_space<vmem>>, %arg3: memref<32x32xf32, #tpu.memory_space<vmem>>, %arg4: memref<32x1xf32, #tpu.memory_space<vmem>>, %arg5: memref<32x1xf32, #tpu.memory_space<vmem>>, %arg6: memref<1x1xf32, #tpu.memory_space<smem>>, %arg7: memref<1x128xf32, #tpu.memory_space<vmem>>) attributes {dimension_semantics = [], scalar_prefetch = 0 : i64, scratch_operands = 0 : i64, tpu.core_type = #tpu.core_type<tc>} {
    %c0 = arith.constant 0 : index
    %c0_0 = arith.constant 0 : index
    %0 = vector.load %arg0[%c0, %c0_0] : memref<1x128xf32, #tpu.memory_space<vmem>>, vector<1x128xf32>
    %cst = arith.constant 0.000000e+00 : f32
    %1 = vector.broadcast %cst : f32 to vector<1x128xf32>
    %2 = arith.subf %0, %1 : vector<1x128xf32>
    %cst_1 = arith.constant 5.000000e+00 : f32
    %3 = vector.broadcast %cst_1 : f32 to vector<1x128xf32>
    %4 = arith.divf %2, %3 : vector<1x128xf32>
    %cst_2 = arith.constant 2.000000e+00 : f32
    %5 = vector.broadcast %cst_2 : f32 to vector<1x128xf32>
    %6 = arith.mulf %4, %5 : vector<1x128xf32>
    %cst_3 = arith.constant 1.000000e+00 : f32
    %7 = vector.broadcast %cst_3 : f32 to vector<1x128xf32>
    %8 = arith.subf %6, %7 : vector<1x128xf32>
    %c0_4 = arith.constant 0 : index
    %c0_5 = arith.constant 0 : index
    %9 = vector.load %arg1[%c0_4, %c0_5] : memref<32x1xf32, #tpu.memory_space<vmem>>, vector<32x1xf32>
    %10 = vector.broadcast %9 : vector<32x1xf32> to vector<32x128xf32>
    %11 = vector.broadcast %8 : vector<1x128xf32> to vector<32x128xf32>
    %12 = arith.mulf %10, %11 : vector<32x128xf32>
    %c0_6 = arith.constant 0 : index
    %c0_7 = arith.constant 0 : index
    %13 = vector.load %arg2[%c0_6, %c0_7] : memref<32x1xf32, #tpu.memory_space<vmem>>, vector<32x1xf32>
    %14 = vector.broadcast %13 : vector<32x1xf32> to vector<32x128xf32>
    %15 = arith.addf %12, %14 : vector<32x128xf32>
    %16 = math.tanh %15 : vector<32x128xf32>
    %c0_8 = arith.constant 0 : index
    %c0_9 = arith.constant 0 : index
    %17 = vector.load %arg3[%c0_8, %c0_9] : memref<32x32xf32, #tpu.memory_space<vmem>>, vector<32x32xf32>
    %cst_10 = arith.constant dense<0.000000e+00> : vector<32x128xf32>
    %18 = tpu.matmul %17, %16, %cst_10 {dimension_numbers = #tpu.dot_dimension_numbers<[1], [0], [0], [1], [0, 0, 1, 1], [], []>} : vector<32x32xf32>, vector<32x128xf32>, vector<32x128xf32> -> vector<32x128xf32>
    %c0_11 = arith.constant 0 : index
    %c0_12 = arith.constant 0 : index
    %19 = vector.load %arg4[%c0_11, %c0_12] : memref<32x1xf32, #tpu.memory_space<vmem>>, vector<32x1xf32>
    %20 = vector.broadcast %19 : vector<32x1xf32> to vector<32x128xf32>
    %21 = arith.addf %18, %20 : vector<32x128xf32>
    %22 = math.tanh %21 : vector<32x128xf32>
    %c0_13 = arith.constant 0 : index
    %c0_14 = arith.constant 0 : index
    %23 = vector.load %arg5[%c0_13, %c0_14] : memref<32x1xf32, #tpu.memory_space<vmem>>, vector<32x1xf32>
    %24 = vector.broadcast %23 : vector<32x1xf32> to vector<32x128xf32>
    %25 = arith.mulf %24, %22 : vector<32x128xf32>
    %cst_15 = arith.constant dense<0.000000e+00> : vector<128xf32>
    %26 = vector.multi_reduction <add>, %25, %cst_15 [0] : vector<32x128xf32> to vector<128xf32>
    %27 = vector.shape_cast %26 : vector<128xf32> to vector<1x128xf32>
    %c0_16 = arith.constant 0 : index
    %c0_17 = arith.constant 0 : index
    %28 = memref.load %arg6[%c0_16, %c0_17] : memref<1x1xf32, #tpu.memory_space<smem>>
    %29 = vector.broadcast %28 : f32 to vector<1x128xf32>
    %30 = arith.addf %27, %29 : vector<1x128xf32>
    %c0_18 = arith.constant 0 : index
    %c0_19 = arith.constant 0 : index
    %31 = vector.load %arg7[%c0_18, %c0_19] : memref<1x128xf32, #tpu.memory_space<vmem>>, vector<1x128xf32>
    tpu.vector_store %arg7[%c0_18, %c0_19], %30 {strides = array<i32>} : memref<1x128xf32, #tpu.memory_space<vmem>>, vector<1x128xf32>,
    return
  }
}

</mosaic_0001>

<bundles_post_ra>
// kernel: tpu_custom_call.1
= control target key start
LH: loop header
LB: loop body
LE: loop exit
PB: predicated region body
PF: predicated region fallthrough
CT: control target
= control target key end

     0   :  { %v361_v2 = vmov 0   ;;  %s476_s0 = inlined_call_operand.vmem [shape: f32[1,128], index: 0, kind: input, shape index: {}]   ;;  %s477_s1 = inlined_call_operand.vmem [shape: f32[32,1], index: 1, kind: input, shape index: {}]   ;;  %s478_s2 = inlined_call_operand.vmem [shape: f32[32,1], index: 2, kind: input, shape index: {}]   ;;  %s479_s3 = inlined_call_operand.vmem [shape: f32[32,32], index: 3, kind: input, shape index: {}]   ;;  %s480_s4 = inlined_call_operand.vmem [shape: f32[32,1], index: 4, kind: input, shape index: {}]   ;;  %s481_s5 = inlined_call_operand.vmem [shape: f32[32,1], index: 5, kind: input, shape index: {}]   ;;  %s482_s6 = inlined_call_operand.<no memory space> [shape: f32[1,1], index: 6, kind: input, shape index: {}]   ;;  %s483_s7 = inlined_call_operand.hbm [shape: f32[1,128], index: 7, kind: output, shape index: {}]  }
   0x1   :  { %v70_v0 = vld [vmem:[%s478_s2 + $0x18] sm:$0xff]  ;;  %322 = vset.pattern.permute.xlu1 %v361_v2  ;;  %321 = vset.pattern.permute.xlu0 %v361_v2  ;;  %v35_v3 = vld [vmem:[%s477_s1 + $0x10] sm:$0xff]  ;;  %v34_v4 = vld [vmem:[%s477_s1 + $0x8] sm:$0xff] }
   0x2   :  { %v36_v1 = vld [vmem:[%s477_s1 + $0x18] sm:$0xff]  ;;  %88 = vperm.xlu1 %322, %v70_v0  }
   0x3   :  { %54 = vperm.xlu0 %321, %v36_v1  }
   0x4   :  { %13 = vsyncpa [#allocation4], 0  ;;  %v69_v5 = vld [vmem:[%s478_s2 + $0x10] sm:$0xff]  ;;  %v33_v6 = vld [vmem:[%s477_s1] sm:$0xff]  ;;  %vm127_vm0 = vcmask 261120   ;;  %v58_v20 = vlaneseq  ;;  %s362_s16 = smov [#allocation3]  }
   0x5   :  { %v68_v7 = vld [vmem:[%s478_s2 + $0x8] sm:$0xff]  ;;  %v67_v8 = vld [vmem:[%s478_s2] sm:$0xff]  ;;  %v105_v11 = vld [vmem:[%s480_s4 + $0x10] sm:$0xff]  ;;  %s276_s17 = sshll.u32 %s362_s16, 4  ;;  %s277_s17 = int_to_ptr.vmem [resolvable:$true] %s276_s17 }
   0x6   :  { %44 = vperm.xlu1 %322, %v34_v4   ;;  %v103_v9 = vld [vmem:[%s480_s4] sm:$0xff]  ;;  %v104_v10 = vld [vmem:[%s480_s4 + $0x8] sm:$0xff]  ;;  %v106_v12 = vld [vmem:[%s480_s4 + $0x18] sm:$0xff]  ;;  %v59_v22 = vshrl.u32 %v58_v20, 7  ;;  %s339_s18 = scalar_lea.vmem %s277_s17, 16  ;;  %s343_s19 = scalar_lea.vmem %s277_s17, 32 }
   0x7   :  { %49 = vperm.xlu0 %321, %v35_v3   ;;  %v229_v13 = vld [vmem:[%s481_s5] sm:$0xff]  ;;  %v230_v14 = vld [vmem:[%s481_s5 + $0x8] sm:$0xff]  ;;  %v231_v15 = vld [vmem:[%s481_s5 + $0x10] sm:$0xff]  ;;  %p340_p0 = scmp.ne.s32.totalorder %s277_s17, %s339_s18  ;;  %p344_p1 = scmp.lt.s32.totalorder %s277_s17, %s277_s17 }
   0x8   :  { %v232_v16 = vld [vmem:[%s481_s5 + $0x18] sm:$0xff]  ;;  %v99_v17 = vld [vmem:[%s479_s3] sm:$0xff]  ;;  %v101_v18 = vld [vmem:[%s479_s3 + $0x10] sm:$0xff]  ;;  %v60_v24 = vsub.s32 0, %v59_v22  ;;  %p345_p2 = scmp.lt.s32.totalorder %s343_s19, %s339_s18 }
   0x9   :  { %305 = vmatprep.mubr.msk.f32.mxu0 %vm127_vm0, %v99_v17  ;;  %308 = vmatprep.mubr.msk.f32.mxu1 %vm127_vm0, %v101_v18  ;;  %v28_v19 = vld [vmem:[%s476_s0] sm:$0x1]  ;;  %v100_v47 = vld [vmem:[%s479_s3 + $0x8] sm:$0xff]  ;;  %v102_v48 = vld [vmem:[%s479_s3 + $0x18] sm:$0xff]  ;;  %v267_v17 = vstv %s482_s6 }
   0xa   :  { %39 = vperm.xlu1 %322, %v33_v6   ;;  %v30_v21 = vmul.f32 0.2, %v28_v19  ;;  %p346_p3 = por %p345_p2, %p344_p1 }
   0xb   :  { %83 = vperm.xlu0 %321, %v69_v5  }
   0xc   :  { %v31_v23 = vmul.f32 2.0, %v30_v21  ;;  %p347_p4 = pnand %p346_p3, %p340_p0 }
   0xe   :  { %73 = vperm.xlu1 %322, %v67_v8   ;;  %v284_v25 = vadd.f32 -1.0, %v31_v23 }
   0xf   :  { %78 = vperm.xlu0 %321, %v68_v7  }
  0x10   :  { %v61_v26 = vrot.slane %v284_v25, %v60_v24 }
  0x12   :  { %114 = vperm.xlu1 %322, %v104_v10  }
  0x13   :  { %109 = vperm.xlu0 %321, %v103_v9  }
  0x16   :  { %124 = vperm.xlu1 %322, %v106_v12  }
  0x17   :  { %119 = vperm.xlu0 %321, %v105_v11  }
  0x1a   :  { %240 = vperm.xlu1 %322, %v230_v14  }
  0x1b   :  { %235 = vperm.xlu0 %321, %v229_v13  }
  0x1e   :  { %250 = vperm.xlu1 %322, %v232_v16  }
  0x1f   :  { %245 = vperm.xlu0 %321, %v231_v15  }
  0x7d   :  { %v89_v27 = vpop.permute.xlu1 %88 }
  0x7e   :  { %v55_v28 = vpop.permute.xlu0 %54 }
  0x7f   :  { %v66_v29 = vmul.f32 %v61_v26, %v55_v28 }
  0x81   :  { %v94_v30 = vadd.f32 %v89_v27, %v66_v29  ;;  %v45_v32 = vpop.permute.xlu1 %44 }
  0x82   :  { %v50_v31 = vpop.permute.xlu0 %49  ;;  %v64_v37 = vmul.f32 %v61_v26, %v45_v32 }
  0x83   :  { %323 = vtanh.f32 %v94_v30  ;;  %v65_v33 = vmul.f32 %v61_v26, %v50_v31 }
  0x85   :  { %v40_v35 = vpop.permute.xlu1 %39 }
  0x86   :  { %v84_v34 = vpop.permute.xlu0 %83  ;;  %v63_v38 = vmul.f32 %v61_v26, %v40_v35 }
  0x87   :  { %v93_v36 = vadd.f32 %v84_v34, %v65_v33 }
  0x89   :  { %325 = vtanh.f32 %v93_v36  ;;  %v74_v40 = vpop.permute.xlu1 %73 }
  0x8a   :  { %v79_v39 = vpop.permute.xlu0 %78  ;;  %v91_v42 = vadd.f32 %v74_v40, %v63_v38 }
  0x8b   :  { %v92_v41 = vadd.f32 %v79_v39, %v64_v37 }
  0x8d   :  { %327 = vtanh.f32 %v92_v41  ;;  %v115_v50 = vpop.permute.xlu1 %114 }
  0x8e   :  { %329 = vtanh.f32 %v91_v42  ;;  %v110_v49 = vpop.permute.xlu0 %109 }
  0x90   :  { %v324_v43 = vpop.eup %323 }
  0x91   :  { %297 = vmatprep.subr.mxu0 %v324_v43  ;;  %311 = vmatprep.subr.mxu1 %v324_v43  ;;  %v125_v54 = vpop.permute.xlu1 %124 }
  0x92   :  { %298 = vmatpush3.msra.mxu0 %v324_v43  ;;  %315 = vmatpush3.msra.mxu1 %v324_v43  ;;  %v120_v53 = vpop.permute.xlu0 %119 }
  0x95   :  { %v241_v63 = vpop.permute.xlu1 %240 }
  0x96   :  { %v326_v44 = vpop.eup %325  ;;  %v236_v61 = vpop.permute.xlu0 %235 }
  0x97   :  { %299 = vmatprep.subr.mxu0 %v326_v44  ;;  %312 = vmatprep.subr.mxu1 %v326_v44 }
  0x98   :  { %300 = vmatpush3.msra.mxu0 %v326_v44  ;;  %316 = vmatpush3.msra.mxu1 %v326_v44 }
  0x99   :  { %v251_v8 = vpop.permute.xlu1 %250 }
  0x9a   :  { %v328_v45 = vpop.eup %327  ;;  %v246_v5 = vpop.permute.xlu0 %245 }
  0x9b   :  { %301 = vmatprep.subr.mxu0 %v328_v45  ;;  %313 = vmatprep.subr.mxu1 %v328_v45  ;;  %v330_v46 = vpop.eup %329 }
  0x9c   :  { %302 = vmatpush3.msra.mxu0 %v328_v45  ;;  %317 = vmatpush3.msra.mxu1 %v328_v45 }
  0x9d   :  { %303 = vmatprep.subr.mxu0 %v330_v46  ;;  %314 = vmatprep.subr.mxu1 %v330_v46 }
  0x9e   :  { %304 = vmatpush3.msra.mxu0 %v330_v46  ;;  %318 = vmatpush3.msra.mxu1 %v330_v46 }
  0x9f   :  { %306 = vmatmul.mubr.msk.f32.vlgmr.msra.gmra.mxu0 %vm127_vm0, %v100_v47  ;;  %309 = vmatmul.mubr.msk.f32.vlgmr.msra.gmra.mxu1 %vm127_vm0, %v102_v48 }
 0x15f   :  { %v307_v51 = vpop.f32.mrf.mxu0  ;;  %v310_v52 = vpop.f32.mrf.mxu1 }
 0x160   :  { %v212_v55 = vadd.f32 %v307_v51, %v115_v50  ;;  %v222_v58 = vadd.f32 %v310_v52, %v125_v54 }
 0x161   :  { %v206_v56 = vpop.f32.mrf.mxu0  ;;  %v216_v57 = vpop.f32.mrf.mxu1 }
 0x162   :  { %331 = vtanh.f32 %v212_v55  ;;  %v207_v59 = vadd.f32 %v206_v56, %v110_v49  ;;  %v217_v60 = vadd.f32 %v216_v57, %v120_v53 }
 0x164   :  { %333 = vtanh.f32 %v207_v59 }
 0x165   :  { %335 = vtanh.f32 %v217_v60 }
 0x166   :  { %337 = vtanh.f32 %v222_v58 }
 0x16f   :  { %v332_v62 = vpop.eup %331 }
 0x170   :  { %v254_v2 = vmul.f32 %v332_v62, %v241_v63 }
 0x171   :  { %v334_v0 = vpop.eup %333 }
 0x172   :  { %v336_v1 = vpop.eup %335  ;;  %v253_v3 = vmul.f32 %v334_v0, %v236_v61 }
 0x173   :  { %v338_v4 = vpop.eup %337  ;;  %v255_v6 = vmul.f32 %v336_v1, %v246_v5 }
 0x174   :  { %v257_v7 = vadd.f32 %v254_v2, %v253_v3  ;;  %v256_v9 = vmul.f32 %v338_v4, %v251_v8 }
 0x176   :  { %v258_v10 = vadd.f32 %v257_v7, %v255_v6 }
 0x178   :  { %v259_v11 = vadd.f32 %v258_v10, %v256_v9 }
 0x17a   :  { %v260_v12 = vrot.slane %v259_v11, 4 }
 0x17c   :  { %v261_v13 = vadd.f32 %v260_v12, %v259_v11 }
 0x17e   :  { %v262_v14 = vrot.slane %v261_v13, 2 }
 0x180   :  { %v263_v15 = vadd.f32 %v262_v14, %v261_v13 }
 0x182   :  { %v264_v16 = vrot.slane %v263_v15, 1 }
 0x184   :  { %v265_v18 = vadd.f32 %v264_v16, %v263_v15 }
 0x186   :  { %v268_v19 = vadd.f32 %v267_v17, %v265_v18 }
 0x188   :  { %269 = vst [vmem:[#allocation3] sm:$0x1] %v268_v19 }
 0x189   :  { %350 = shalt.err (!%p347_p4)
}
 0x18a   :  { %279 = dma.vmem_to_hbm [thread:$0]  %s277_s17, 16, %s483_s7, [#allocation4]  }
 0x18b   :  { %359 = dma.done.wait [#allocation4], 16  }
 0x18c   :  { %360 = vsyncadd [#allocation4], 4294967280 }
 0x18d   :  { %283 = vsyncpa [#allocation4], 1 }

</bundles_post_ra>
